<compile_context>
chip_gen: v6e
topology: v6e:2x2x1
jax: 0.10.0
libtpu: 0.0.40
codegen_flags: <defaults>
</compile_context>

<pallas_src>
import jax
import jax.numpy as jnp
from jax.experimental import pallas as pl
from jax.experimental.pallas import tpu as pltpu


# ----------------------------- kernels ------------------------------------- #

def _fused_kernel(goal_norm_ref, goal_up_ref, wt_ref, out_ref):
    """Single-block path: matmul + add + global min/max normalize in one shot."""
    gu = jnp.dot(goal_up_ref[...], wt_ref[...], preferred_element_type=jnp.float32)
    goal = gu + goal_norm_ref[...].astype(jnp.float32)
    mn = jnp.min(goal, keepdims=True)                      # (1, 1) global min
    mx = jnp.max(goal, keepdims=True)                      # (1, 1) global max
    inv = pl.reciprocal(mx - mn + jnp.float32(1e-9), approx=False)
    out_ref[...] = ((goal - mn) * inv).astype(out_ref.dtype)


def _tiled_linear_add_kernel(goal_norm_ref, goal_up_ref, wt_ref, out_ref):
    """N-tiled path, pass 1: out[:, tile] = goal_up @ W^T[:, tile] + goal_norm[:, tile]."""
    gu = jnp.dot(goal_up_ref[...], wt_ref[...], preferred_element_type=jnp.float32)
    out_ref[...] = (gu + goal_norm_ref[...].astype(jnp.float32)).astype(out_ref.dtype)


def _normalize_kernel(goal_ref, out_ref):
    """N-tiled path, pass 2: global min/max normalize of the small [NW, H] result."""
    g = goal_ref[...].astype(jnp.float32)
    mn = jnp.min(g, keepdims=True)
    mx = jnp.max(g, keepdims=True)
    inv = pl.reciprocal(mx - mn + jnp.float32(1e-9), approx=False)
    out_ref[...] = ((g - mn) * inv).astype(out_ref.dtype)


# ----------------------------- helpers ------------------------------------- #

def _vmem_capacity_bytes():
    """Physical per-core VMEM; conservative 64 MiB (v7x) fallback if query fails."""
    try:
        info = pltpu.get_tpu_info()
        cap = getattr(info, "vmem_capacity_bytes", None)
        if cap:
            return int(cap)
    except Exception:
        pass
    return 64 << 20


def _vmem_limit(needed_bytes, capacity_bytes):
    """Always pass an explicit limit: >= 32 MiB floor, <= physical capacity."""
    return int(min(capacity_bytes, max(needed_bytes, 32 << 20)))


def _pick_tile_n(hidden_dim):
    for tn in (1024, 512, 256, 128):
        if hidden_dim % tn == 0:
            return tn
    return None


# ----------------------------- wrapper ------------------------------------- #

def hierarchy4_back_forward(goal_norm, goal_up, hierarchies_selected, weight,
                            *, mxu_dtype=None):
    """goal_norm, goal_up: [num_workers, hidden_dim] (f32).
    weight: [hidden_dim, hidden_dim] in PyTorch nn.Linear layout ([out, in]).
    hierarchies_selected does not affect the returned goal (matches the module).
    mxu_dtype: optionally stream matmul operands in e.g. jnp.bfloat16 (f32 accum)."""
    del hierarchies_selected
    num_workers, hidden_dim = goal_up.shape
    out_dtype = goal_norm.dtype
    cap = _vmem_capacity_bytes()

    # One-time transpose to [in, out] so the kernel contraction is [M,K] x [K,N]
    # (no per-tile transpose in front of the MXU).  Cache w_t for repeated calls.
    w_t = weight.T
    gu_in = goal_up
    if mxu_dtype is not None:
        w_t = w_t.astype(mxu_dtype)
        gu_in = goal_up.astype(mxu_dtype)

    itemsize = jnp.dtype(w_t.dtype).itemsize
    headroom = 2 << 20

    # Fused single-block footprint: inputs + weight + output + f32 intermediates.
    fused_bytes = (itemsize * hidden_dim * hidden_dim
                   + 4 * 6 * num_workers * hidden_dim
                   + headroom)
    tn = _pick_tile_n(hidden_dim)
    use_fused = (fused_bytes <= cap // 2) or (tn is None)

    if use_fused:
        return pl.pallas_call(
            _fused_kernel,
            out_shape=jax.ShapeDtypeStruct((num_workers, hidden_dim), out_dtype),
            in_specs=[
                pl.BlockSpec(memory_space=pltpu.MemorySpace.VMEM),  # goal_norm
                pl.BlockSpec(memory_space=pltpu.MemorySpace.VMEM),  # goal_up
                pl.BlockSpec(memory_space=pltpu.MemorySpace.VMEM),  # W^T [in, out]
            ],
            out_specs=pl.BlockSpec(memory_space=pltpu.MemorySpace.VMEM),
            compiler_params=pltpu.CompilerParams(
                vmem_limit_bytes=_vmem_limit(fused_bytes, cap)),
        )(goal_norm, gu_in, w_t)

    # ---- Large-H path: tile the weight's output-column axis ("parallel"). ---- #
    k = hidden_dim
    tiled_bytes = (2 * itemsize * (num_workers * k + k * tn)       # goal_up + W tile (x2 bufs)
                   + 4 * 6 * num_workers * tn                      # norm/out tiles + intermediates
                   + headroom)
    goal_lin = pl.pallas_call(
        _tiled_linear_add_kernel,
        out_shape=jax.ShapeDtypeStruct((num_workers, hidden_dim), jnp.float32),
        grid_spec=pltpu.PrefetchScalarGridSpec(
            num_scalar_prefetch=0,
            grid=(hidden_dim // tn,),
            in_specs=[
                pl.BlockSpec((num_workers, tn), lambda n: (0, n)),  # goal_norm tile
                pl.BlockSpec((num_workers, k), lambda n: (0, 0)),   # goal_up (resident)
                pl.BlockSpec((k, tn), lambda n: (0, n)),            # W^T tile (streamed)
            ],
            out_specs=pl.BlockSpec((num_workers, tn), lambda n: (0, n)),
        ),
        compiler_params=pltpu.CompilerParams(
            dimension_semantics=("parallel",),
            vmem_limit_bytes=_vmem_limit(tiled_bytes, cap)),
    )(goal_norm, gu_in, w_t)

    norm_bytes = 4 * 3 * num_workers * hidden_dim + (1 << 20)
    return pl.pallas_call(
        _normalize_kernel,
        out_shape=jax.ShapeDtypeStruct((num_workers, hidden_dim), out_dtype),
        in_specs=[pl.BlockSpec(memory_space=pltpu.MemorySpace.VMEM)],
        out_specs=pl.BlockSpec(memory_space=pltpu.MemorySpace.VMEM),
        compiler_params=pltpu.CompilerParams(
            vmem_limit_bytes=_vmem_limit(norm_bytes, cap)),
    )(goal_lin)


# ----------------------------- reference / demo ---------------------------- #

def reference_forward(goal_norm, goal_up, weight):
    gu = goal_up @ weight.T
    goal = gu + goal_norm
    mn = jnp.min(goal)
    mx = jnp.max(goal)
    return (goal - mn) / (mx - mn + 1e-9)


if __name__ == "__main__":
    num_workers = 8
    hidden_dim = 32

    key = jax.random.PRNGKey(0)
    k1, k2, k3, k4 = jax.random.split(key, 4)

    goal_norm = jax.random.normal(k1, (num_workers, hidden_dim), dtype=jnp.float32)
    goal_up = jax.random.normal(k2, (num_workers, hidden_dim), dtype=jnp.float32)
    hierarchies_selected = jax.random.randint(k3, (num_workers,), 0, 2).astype(jnp.float32)

    # Deterministic nn.Linear-style init: U(-1/sqrt(in), 1/sqrt(in)), shape [out, in]
    bound = 1.0 / (hidden_dim ** 0.5)
    weight = jax.random.uniform(
        k4, (hidden_dim, hidden_dim), minval=-bound, maxval=bound, dtype=jnp.float32
    )

    out = hierarchy4_back_forward(goal_norm, goal_up, hierarchies_selected, weight)
    out = jax.block_until_ready(out)

    ref = reference_forward(goal_norm, goal_up, weight)
    assert out.shape == (num_workers, hidden_dim)
    assert jnp.allclose(out, ref, atol=1e-5, rtol=1e-5), "mismatch vs reference"

    print("KERNEL_OK")
</pallas_src>

<mosaic_0001>
module attributes {stable_mosaic.version = 11 : i64} {
  func.func @_fused_kernel(%arg0: memref<8x32xf32, #tpu.memory_space<vmem>>, %arg1: memref<8x32xf32, #tpu.memory_space<vmem>>, %arg2: memref<32x32xf32, #tpu.memory_space<vmem>>, %arg3: memref<8x32xf32, #tpu.memory_space<vmem>>) attributes {dimension_semantics = [], scalar_prefetch = 0 : i64, scratch_operands = 0 : i64, tpu.core_type = #tpu.core_type<tc>} {
    %c0 = arith.constant 0 : index
    %c0_0 = arith.constant 0 : index
    %0 = vector.load %arg1[%c0, %c0_0] : memref<8x32xf32, #tpu.memory_space<vmem>>, vector<8x32xf32>
    %c0_1 = arith.constant 0 : index
    %c0_2 = arith.constant 0 : index
    %1 = vector.load %arg2[%c0_1, %c0_2] : memref<32x32xf32, #tpu.memory_space<vmem>>, vector<32x32xf32>
    %cst = arith.constant dense<0.000000e+00> : vector<8x32xf32>
    %2 = tpu.matmul %0, %1, %cst {dimension_numbers = #tpu.dot_dimension_numbers<[1], [0], [0], [1], [0, 0, 1, 1], [], []>} : vector<8x32xf32>, vector<32x32xf32>, vector<8x32xf32> -> vector<8x32xf32>
    %c0_3 = arith.constant 0 : index
    %c0_4 = arith.constant 0 : index
    %3 = vector.load %arg0[%c0_3, %c0_4] : memref<8x32xf32, #tpu.memory_space<vmem>>, vector<8x32xf32>
    %4 = arith.addf %2, %3 : vector<8x32xf32>
    %5 = vector.shape_cast %4 : vector<8x32xf32> to vector<1x8x32xf32>
    %cst_5 = arith.constant dense<0x7F800000> : vector<1xf32>
    %6 = vector.multi_reduction <minimumf>, %5, %cst_5 [1, 2] : vector<1x8x32xf32> to vector<1xf32>
    %7 = vector.shape_cast %6 : vector<1xf32> to vector<1x1x1xf32>
    %8 = vector.extract %7[0, 0, 0] : f32 from vector<1x1x1xf32>
    %9 = vector.broadcast %8 : f32 to vector<1x1xf32>
    %10 = vector.shape_cast %4 : vector<8x32xf32> to vector<1x8x32xf32>
    %cst_6 = arith.constant dense<0xFF800000> : vector<1xf32>
    %11 = vector.multi_reduction <maximumf>, %10, %cst_6 [1, 2] : vector<1x8x32xf32> to vector<1xf32>
    %12 = vector.shape_cast %11 : vector<1xf32> to vector<1x1x1xf32>
    %13 = vector.extract %12[0, 0, 0] : f32 from vector<1x1x1xf32>
    %14 = vector.broadcast %13 : f32 to vector<1x1xf32>
    %15 = arith.subf %14, %9 : vector<1x1xf32>
    %cst_7 = arith.constant 9.99999971E-10 : f32
    %16 = vector.broadcast %cst_7 : f32 to vector<1x1xf32>
    %17 = arith.addf %15, %16 : vector<1x1xf32>
    %18 = tpu.reciprocal %17 : vector<1x1xf32> -> vector<1x1xf32>
    %19 = vector.broadcast %9 : vector<1x1xf32> to vector<8x32xf32>
    %20 = arith.subf %4, %19 : vector<8x32xf32>
    %21 = vector.broadcast %18 : vector<1x1xf32> to vector<8x32xf32>
    %22 = arith.mulf %20, %21 : vector<8x32xf32>
    %c0_8 = arith.constant 0 : index
    %c0_9 = arith.constant 0 : index
    %23 = vector.load %arg3[%c0_8, %c0_9] : memref<8x32xf32, #tpu.memory_space<vmem>>, vector<8x32xf32>
    tpu.vector_store %arg3[%c0_8, %c0_9], %22 {strides = array<i32>} : memref<8x32xf32, #tpu.memory_space<vmem>>, vector<8x32xf32>,
    return
  }
}

</mosaic_0001>

<bundles_post_ra>
// kernel: tpu_custom_call.1
= control target key start
LH: loop header
LB: loop body
LE: loop exit
PB: predicated region body
PF: predicated region fallthrough
CT: control target
= control target key end

     0   :  { %8 = vsyncpa [#allocation3], 0  ;;  %s337_s0 = inlined_call_operand.hbm [shape: f32[8,32], index: 0, kind: input, shape index: {}]   ;;  %s338_s1 = inlined_call_operand.hbm [shape: f32[8,32], index: 1, kind: input, shape index: {}]   ;;  %s339_s2 = inlined_call_operand.hbm [shape: f32[32,32], index: 2, kind: input, shape index: {}]   ;;  %s340_s3 = inlined_call_operand.hbm [shape: f32[8,32], index: 3, kind: output, shape index: {}]  }
   0x1   :  { %9 = vsyncpa [#allocation6], 0 }
   0x2   :  { %10 = vsyncpa [#allocation4], 0  ;;  %s293_s12 = smov [#allocation5]   ;;  %s294_s14 = smov [#allocation2]  }
   0x3   :  { %s27_s13 = sshll.u32 %s293_s12, 4  ;;  %s17_s15 = sshll.u32 %s294_s14, 4  ;;  %s28_s13 = int_to_ptr.vmem [resolvable:$true] %s27_s13  ;;  %s18_s15 = int_to_ptr.vmem [resolvable:$true] %s17_s15 }
   0x4   :  { %s215_s16 = scalar_lea.vmem %s28_s13, 128  ;;  %p220_p1 = scmp.lt.s32.totalorder %s28_s13, %s28_s13 }
   0x5   :  { %p216_p0 = scmp.ne.s32.totalorder %s28_s13, %s215_s16  ;;  %p221_p2 = scmp.lt.s32.totalorder %s215_s16, %s215_s16 }
   0x7   :  { %p222_p3 = por %p221_p2, %p220_p1 }
   0x9   :  { %p223_p4 = pnand %p222_p3, %p216_p0 }
   0xb   :  { %226 = shalt.err (!%p223_p4)
}
   0xc   :  { %30 = dma.hbm_to_vmem [thread:$0]  %s338_s1, 128, %s28_s13, [#allocation6]  }
   0xd   :  { %s235_s19 = scalar_lea.vmem %s18_s15, 128  ;;  %p240_p6 = scmp.lt.s32.totalorder %s18_s15, %s18_s15 }
   0xe   :  { %p236_p5 = scmp.ne.s32.totalorder %s18_s15, %s235_s19  ;;  %p241_p7 = scmp.lt.s32.totalorder %s235_s19, %s235_s19 }
  0x10   :  { %p242_p8 = por %p241_p7, %p240_p6 }
  0x12   :  { %p243_p9 = pnand %p242_p8, %p236_p5 }
  0x14   :  { %246 = shalt.err (!%p243_p9)
}
  0x15   :  { %20 = dma.hbm_to_vmem [thread:$0]  %s337_s0, 128, %s18_s15, [#allocation3]  }
  0x16   :  { %s295_s22 = smov [#allocation7]  }
  0x17   :  { %s36_s23 = sshll.u32 %s295_s22, 4  ;;  %s37_s23 = int_to_ptr.vmem [resolvable:$true] %s36_s23 }
  0x18   :  { %s255_s24 = scalar_lea.vmem %s37_s23, 512  ;;  %p260_p11 = scmp.lt.s32.totalorder %s37_s23, %s37_s23 }
  0x19   :  { %p256_p10 = scmp.ne.s32.totalorder %s37_s23, %s255_s24  ;;  %p261_p12 = scmp.lt.s32.totalorder %s255_s24, %s255_s24 }
  0x1b   :  { %p262_p13 = por %p261_p12, %p260_p11 }
  0x1d   :  { %p263_p0 = pnand %p262_p13, %p256_p10 }
  0x1f   :  { %266 = shalt.err (!%p263_p0)
}
  0x20   :  { %s296_s1 = smov 128   ;;  %s297_s25 = smov 8  }
  0x21   :  { %42 = dma.hbm_to_vmem [thread:$0]  %s339_s2, 512, %s37_s23, [#allocation6], %s296_s1, %s296_s1, %s297_s25  }
  0x22   :  { %287 = dma.done.wait [#allocation3], 128  }
  0x23   :  { %288 = vsyncadd [#allocation3], 4294967168 }
  0x24   :  { %289 = dma.done.wait [#allocation6], 640  }
  0x25   :  { %290 = vsyncadd [#allocation6], 4294966656  ;;  %v298_v0 = vmov 0.0   ;;  %vm299_vm0 = vmmov 0   ;;  %v56_v1 = vld [vmem:[#allocation7 + $0x18] sm:$0xff]  ;;  %v55_v2 = vld [vmem:[#allocation7 + $0x10] sm:$0xff] }
  0x26   :  { %182 = vmatprep.subr.mxu0 %v298_v0  ;;  %190 = vmatprep.mubr.msk.f32.mxu0 %vm299_vm0, %v298_v0  ;;  %v54_v3 = vld [vmem:[#allocation7 + $0x8] sm:$0xff]  ;;  %v53_v4 = vld [vmem:[#allocation7] sm:$0xff]  ;;  %v52_v5 = vld [vmem:[#allocation5] sm:$0xff]  ;;  %vm58_vm1 = vcmask 261120   ;;  %s300_s28 = smov [#allocation8]  }
  0x27   :  { %183 = vmatpush3.msra.mxu0 %v56_v1  ;;  %v57_v6 = vld [vmem:[#allocation2] sm:$0xff]  ;;  %s166_s29 = sshll.u32 %s300_s28, 4  ;;  %s167_s29 = int_to_ptr.vmem [resolvable:$true] %s166_s29 }
  0x28   :  { %184 = vmatprep.subr.mxu0 %v298_v0  ;;  %s267_s30 = scalar_lea.vmem %s167_s29, 128  ;;  %p272_p2 = scmp.lt.s32.totalorder %s167_s29, %s167_s29 }
  0x29   :  { %185 = vmatpush3.msra.mxu0 %v55_v2  ;;  %p268_p1 = scmp.ne.s32.totalorder %s167_s29, %s267_s30  ;;  %p273_p3 = scmp.lt.s32.totalorder %s267_s30, %s267_s30 }
  0x2a   :  { %186 = vmatprep.subr.mxu0 %v298_v0 }
  0x2b   :  { %187 = vmatpush3.msra.mxu0 %v54_v3  ;;  %p274_p4 = por %p273_p3, %p272_p2 }
  0x2c   :  { %188 = vmatprep.subr.mxu0 %v298_v0 }
  0x2d   :  { %189 = vmatpush3.msra.mxu0 %v53_v4  ;;  %p275_p5 = pnand %p274_p4, %p268_p1 }
  0x2e   :  { %191 = vmatmul.mubr.msk.f32.vlgmr.msra.gmra.mxu0 %vm58_vm1, %v52_v5 }
  0xee   :  { %v128_v7 = vpop.f32.mrf.mxu0 }
  0xef   :  { %v129_v8 = vadd.f32 %v128_v7, %v57_v6 }
  0xf0   :  { %v192_v9 = vpop.f32.mrf.mxu0 }
  0xf1   :  { %v132_v10 = vsel %vm58_vm1, %v129_v8, inf  ;;  %v143_v11 = vsel %vm58_vm1, %v129_v8, -inf }
  0xf2   :  { %133 = vmin.xlane.f32.xlu0 %v132_v10 }
  0xf6   :  { %144 = vmax.xlane.f32.xlu0 %v143_v11 }
 0x17b   :  { %v134_v12 = vpop.xlane.xlu0 %133 }
 0x17c   :  { %v135_v13 = vrot.slane %v134_v12, 4 }
 0x17e   :  { %v136_v14 = vmin.f32 %v134_v12, %v135_v13 }
 0x17f   :  { %v145_v15 = vpop.xlane.xlu0 %144 }
 0x180   :  { %v137_v16 = vrot.slane %v136_v14, 2  ;;  %v146_v17 = vrot.slane %v145_v15, 4 }
 0x182   :  { %v147_v18 = vmax.f32 %v145_v15, %v146_v17  ;;  %v138_v19 = vmin.f32 %v136_v14, %v137_v16 }
 0x184   :  { %v148_v20 = vrot.slane %v147_v18, 2  ;;  %v139_v21 = vrot.slane %v138_v19, 1 }
 0x186   :  { %v149_v22 = vmax.f32 %v147_v18, %v148_v20  ;;  %v140_v23 = vmin.f32 %v138_v19, %v139_v21 }
 0x188   :  { %193 = vpush %v140_v23  ;;  %v150_v24 = vrot.slane %v149_v22, 1 }
 0x18a   :  { %v151_v25 = vmax.f32 %v149_v22, %v150_v24 }
 0x18c   :  { %195 = vpush %v151_v25 }
 0x1b9   :  { %s194_s0 = spop %193 }
 0x1ba   :  { %v142_v26 = vstv %s194_s0 }
 0x1bb   :  { %v157_v30 = vsub.f32 %v129_v8, %v142_v26 }
 0x1bd   :  { %s196_s2 = spop %195 }
 0x1be   :  { %v153_v27 = vstv %s196_s2 }
 0x1bf   :  { %v154_v28 = vsub.f32 %v153_v27, %v142_v26 }
 0x1c1   :  { %v155_v29 = vadd.f32 1e-09, %v154_v28 }
 0x1c3   :  { %205 = vrcp.f32 %v155_v29 }
 0x1d0   :  { %v206_v31 = vpop.eup %205 }
 0x1d1   :  { %v158_v32 = vmul.f32 %v206_v31, %v157_v30 }
 0x1d3   :  { %159 = vst.msk [vmem:[#allocation8] sm:$0xff] %vm58_vm1, %v158_v32 }
 0x1d4   :  { %278 = shalt.err (!%p275_p5)
}
 0x1d5   :  { %169 = dma.vmem_to_hbm [thread:$0]  %s167_s29, 128, %s340_s3, [#allocation4]  }
 0x1d6   :  { %291 = dma.done.wait [#allocation4], 128  }
 0x1d7   :  { %292 = vsyncadd [#allocation4], 4294967168 }
 0x1d8   :  { %173 = vsyncpa [#allocation3], 1 }
 0x1d9   :  { %174 = vsyncpa [#allocation6], 1 }
 0x1da   :  { %175 = vsyncpa [#allocation4], 1 }

</bundles_post_ra>
